<compile_context>
chip_gen: v7x
topology: tpu7x:2x2x1
jax: 0.10.0
libtpu: 0.0.40
codegen_flags: <defaults>
</compile_context>

<pallas_src>
import jax
import jax.numpy as jnp
from jax.experimental import pallas as pl
from jax.experimental.pallas import tpu as pltpu


# ----------------------------------------------------------------------------
# Pallas kernel: one (batch, HW-tile) block, channel-major.
# ----------------------------------------------------------------------------
def _gfu_kernel(apf_ref, w1_ref, b1_ref, w2_ref, bias_ref, o_ref):
    """Fused GFU tile.

    apf_ref : (Ca, T)      apf tile in its incoming dtype, HW on the lane axis
    w1_ref  : (Cout, Ca)   apf 1x1 conv with BN1 folded in (matmul dtype)
    b1_ref  : (Cout, 1)    folded apf bias (f32)
    w2_ref  : (Cout, Cout) out 1x1 conv with BN2 folded in (matmul dtype)
    bias_ref: (Cout, 1)    per-batch fused bias: b_out' + w_out' @ pooled_fab (f32)
    o_ref   : (Cout, T)    output dtype
    """
    # Cast in-kernel (no extra HBM pass in the wrapper); identity if same dtype.
    x = apf_ref[...].astype(w1_ref.dtype)

    # apf branch: conv(+BN folded) -> ReLU   (f32 accumulate)
    a = jnp.dot(w1_ref[...], x, preferred_element_type=jnp.float32)
    a = jnp.maximum(a + b1_ref[...], 0.0)

    # out conv (+BN folded, pooled fab already folded into bias) -> ReLU
    out = jnp.dot(w2_ref[...], a.astype(w2_ref.dtype),
                  preferred_element_type=jnp.float32)
    out = jnp.maximum(out + bias_ref[...], 0.0)

    o_ref[...] = out.astype(o_ref.dtype)


# ----------------------------------------------------------------------------
# Per-generation VMEM capacity and HW-tile selection.
# ----------------------------------------------------------------------------
def _vmem_capacity_bytes():
    try:
        return int(pltpu.get_tpu_info().vmem_capacity_bytes)
    except Exception:
        return 64 * 1024 * 1024  # v7x physical per-TC VMEM: safe lower bound


def _pick_hw_tile(hw, bytes_per_col, budget_bytes, max_tile=32768):
    """Return (tile, hw_padded): tile is a multiple of 128 dividing hw_padded,
    sized so the per-step VMEM working set stays under budget_bytes."""
    cap = (budget_bytes // max(bytes_per_col, 1)) // 128 * 128
    cap = max(128, min(max_tile, cap))
    hw128 = -(-hw // 128) * 128            # mandatory 128-lane alignment
    if hw128 <= cap:
        return hw128, hw128                # one big lane-dense tile
    for t in range(cap, 127, -128):
        hw_t = -(-hw128 // t) * t
        if hw_t - hw128 <= hw128 // 8:     # bound extra padding at 12.5%
            return t, hw_t
    return 128, hw128                      # always valid fallback


# ----------------------------------------------------------------------------
# Public wrapper.
# ----------------------------------------------------------------------------
def gfu_forward(apf_nchw, fab_nchw, params, *, matmul_dtype=None, out_dtype=None):
    """apf: (B, Ca, H, W), fab: (B, Cf, Hf, Wf)  ->  (B, Cout, H, W).

    matmul_dtype / out_dtype default to apf's dtype.  bf16 is valid on v5e,
    v6e and v7x (f32 accumulation; elementwise math stays f32); bf16 output
    halves the dominant HBM writeback stream.
    """
    B, Ca, H, W = apf_nchw.shape
    Cout = params["w_apf"].shape[1]
    HW = H * W
    f32 = jnp.float32
    hi = jax.lax.Precision.HIGHEST

    in_dtype = apf_nchw.dtype
    matmul_dtype = jnp.dtype(in_dtype if matmul_dtype is None else matmul_dtype)
    out_dtype = jnp.dtype(in_dtype if out_dtype is None else out_dtype)

    # ---- host-side BN folding (eval mode; exact) -> channel-major weights ----
    s1 = params["bn1_scale"].reshape(Cout).astype(f32)
    t1 = params["bn1_shift"].reshape(Cout).astype(f32)
    s2 = params["bn2_scale"].reshape(Cout).astype(f32)
    t2 = params["bn2_shift"].reshape(Cout).astype(f32)
    w1 = params["w_apf"].astype(f32).T * s1[:, None]              # (Cout, Ca)
    b1 = params["b_apf"].reshape(Cout).astype(f32) * s1 + t1      # (Cout,)
    w2 = params["w_out"].astype(f32).T * s2[:, None]              # (Cout, Cout)
    b2 = params["b_out"].reshape(Cout).astype(f32) * s2 + t2      # (Cout,)

    # ---- fab branch (plain XLA, small): 1x1 conv at LOW res (commutes exactly
    #      with the bilinear resize), resize the Cout-channel result, ReLU,
    #      global average pool, then fold the pooled vector through the folded
    #      out-conv into a per-batch bias. ----
    w_fab_T = params["w_fab"].astype(f32).T                       # (Cout, Cf)
    fab_low = jnp.einsum("oc,bchw->bohw", w_fab_T, fab_nchw.astype(f32),
                         precision=hi)
    fab_low = fab_low + params["b_fab"].reshape(1, Cout, 1, 1)
    # TODO(synk): jax.image.resize('bilinear') matches F.interpolate(align_corners=False)
    # for plain upsampling; re-check edge behaviour for SSFPN's real scale factors.
    # TODO(synk): at large H*W, verify XLA fuses resize+ReLU+mean; if the
    # (B,Cout,H,W) intermediate materializes, move this reduction into a small
    # tile-wise Pallas pass so only (B,Cout) ever reaches HBM.
    fab_up = jax.image.resize(fab_low, (B, Cout, H, W), method="bilinear")
    pooled = jnp.mean(jnp.maximum(fab_up, 0.0), axis=(2, 3))      # (B, Cout)
    # w2 @ (a + pooled) + b2 == w2 @ a + (w2 @ pooled + b2)
    fused_bias = jnp.einsum("oc,bc->bo", w2, pooled, precision=hi) + b2[None, :]

    # ---- channel-major layout: free reshape of NCHW; no dtype cast here ----
    apf_cm = apf_nchw.reshape(B, Ca, HW)

    # ---- tiling: per-generation VMEM budget, lane-dense tiles ----
    in_item = jnp.dtype(in_dtype).itemsize
    out_item = jnp.dtype(out_dtype).itemsize
    md_item = matmul_dtype.itemsize
    # double-buffered in/out blocks + in-kernel intermediates, per HW column
    bytes_per_col = (2 * (Ca * in_item + Cout * out_item)
                     + Ca * md_item + Cout * (8 + md_item))
    capacity = _vmem_capacity_bytes()
    budget = int(capacity * 0.65)
    tile, hw_pad = _pick_hw_tile(HW, bytes_per_col, budget)
    if hw_pad > HW:  # keep blocks (8,128)-legal when HW is not 128-divisible
        apf_cm = jnp.pad(apf_cm, ((0, 0), (0, 0), (0, hw_pad - HW)))
    n_tiles = hw_pad // tile
    # keep the total step count even so the v7x 2-TC split stays balanced
    if (B * n_tiles) % 2 == 1 and tile % 256 == 0:
        tile //= 2
        n_tiles *= 2

    w1k = w1.astype(matmul_dtype)
    w2k = w2.astype(matmul_dtype)
    b1k = b1.reshape(Cout, 1)
    biask = fused_bias.reshape(B, Cout, 1).astype(f32)

    work_set = (tile * bytes_per_col
                + 4 * (Cout * Ca + Cout * Cout + Cout + B * Cout) + (1 << 20))
    vmem_limit = int(max(16 << 20,
                         min(max(32 << 20, work_set + (8 << 20)),
                             capacity - (8 << 20))))

    out_cm = pl.pallas_call(
        _gfu_kernel,
        out_shape=jax.ShapeDtypeStruct((B, Cout, hw_pad), out_dtype),
        grid_spec=pltpu.PrefetchScalarGridSpec(
            num_scalar_prefetch=0,
            grid=(B, n_tiles),
            in_specs=[
                pl.BlockSpec((None, Ca, tile), lambda b, j: (b, 0, j)),   # apf tile
                pl.BlockSpec((Cout, Ca), lambda b, j: (0, 0)),            # w1 (folded)
                pl.BlockSpec((Cout, 1), lambda b, j: (0, 0)),             # b1 (folded)
                pl.BlockSpec((Cout, Cout), lambda b, j: (0, 0)),          # w2 (folded)
                pl.BlockSpec((None, Cout, 1), lambda b, j: (b, 0, 0)),    # per-batch bias
            ],
            out_specs=pl.BlockSpec((None, Cout, tile), lambda b, j: (b, 0, j)),
        ),
        compiler_params=pltpu.CompilerParams(
            dimension_semantics=("parallel", "parallel"),
            vmem_limit_bytes=vmem_limit,
        ),
    )(apf_cm, w1k, b1k, w2k, biask)

    if hw_pad > HW:
        out_cm = out_cm[:, :, :HW]
    # (B, Cout, HW) -> (B, Cout, H, W): free reshape, no transpose.
    return out_cm.reshape(B, Cout, H, W)


# ----------------------------------------------------------------------------
# Parameters (synthetic, deterministic) and a plain-JAX reference.
# ----------------------------------------------------------------------------
def make_params(key, apf_channel, fab_channel, out_channel, eps=1e-5):
    ks = jax.random.split(key, 10)

    def bn_fold(gamma, beta, running_mean, running_var):
        scale = gamma / jnp.sqrt(running_var + eps)
        shift = beta - running_mean * scale
        return scale.reshape(1, -1), shift.reshape(1, -1)

    w_apf = 0.1 * jax.random.normal(ks[0], (apf_channel, out_channel), jnp.float32)
    b_apf = 0.1 * jax.random.normal(ks[1], (1, out_channel), jnp.float32)
    g1 = 1.0 + 0.1 * jax.random.normal(ks[2], (out_channel,), jnp.float32)
    be1 = 0.1 * jax.random.normal(ks[3], (out_channel,), jnp.float32)
    bn1_scale, bn1_shift = bn_fold(g1, be1, jnp.zeros(out_channel), jnp.ones(out_channel))

    w_fab = 0.1 * jax.random.normal(ks[4], (fab_channel, out_channel), jnp.float32)
    b_fab = 0.1 * jax.random.normal(ks[5], (1, out_channel), jnp.float32)

    w_out = 0.1 * jax.random.normal(ks[6], (out_channel, out_channel), jnp.float32)
    b_out = 0.1 * jax.random.normal(ks[7], (1, out_channel), jnp.float32)
    g2 = 1.0 + 0.1 * jax.random.normal(ks[8], (out_channel,), jnp.float32)
    be2 = 0.1 * jax.random.normal(ks[9], (out_channel,), jnp.float32)
    bn2_scale, bn2_shift = bn_fold(g2, be2, jnp.zeros(out_channel), jnp.ones(out_channel))

    return dict(w_apf=w_apf, b_apf=b_apf, bn1_scale=bn1_scale, bn1_shift=bn1_shift,
                w_fab=w_fab, b_fab=b_fab,
                w_out=w_out, b_out=b_out, bn2_scale=bn2_scale, bn2_shift=bn2_shift)


def gfu_reference(apf, fab, params):
    """Direct JAX port of the PyTorch module (eval-mode BN), for checking."""
    B, Ca, H, W = apf.shape
    Cout = params["w_apf"].shape[1]
    hi = jax.lax.Precision.HIGHEST
    s1 = params["bn1_scale"].reshape(1, Cout, 1, 1)
    t1 = params["bn1_shift"].reshape(1, Cout, 1, 1)
    s2 = params["bn2_scale"].reshape(1, Cout, 1, 1)
    t2 = params["bn2_shift"].reshape(1, Cout, 1, 1)

    def conv1x1(x, w, b):  # w: (Cin, Cout)
        y = jnp.einsum("bchw,co->bohw", x, w, precision=hi)
        return y + b.reshape(1, -1, 1, 1)

    a = jnp.maximum(conv1x1(apf, params["w_apf"], params["b_apf"]) * s1 + t1, 0.0)
    fab_up = jax.image.resize(fab, (B, fab.shape[1], H, W), method="bilinear")
    y = jnp.maximum(conv1x1(fab_up, params["w_fab"], params["b_fab"]), 0.0)
    pooled = jnp.mean(y, axis=(2, 3), keepdims=True)              # (B, Cout, 1, 1)
    f = a + pooled
    out = jnp.maximum(conv1x1(f, params["w_out"], params["b_out"]) * s2 + t2, 0.0)
    return out


if __name__ == "__main__":
    B, APF_C, FAB_C, OUT_C = 2, 8, 16, 8
    H = W = 16          # apf spatial
    HF = WF = 8         # fab spatial (upsampled to H x W inside the op)

    key = jax.random.PRNGKey(0)
    k_apf, k_fab, k_par = jax.random.split(key, 3)

    apf = jax.random.normal(k_apf, (B, APF_C, H, W), jnp.float32)
    fab = jax.random.normal(k_fab, (B, FAB_C, HF, WF), jnp.float32)
    params = make_params(k_par, APF_C, FAB_C, OUT_C)

    # --- default path: f32 in / f32 matmul / f32 out ---
    out = jax.jit(gfu_forward)(apf, fab, params)
    jax.block_until_ready(out)
    assert out.shape == (B, OUT_C, H, W), out.shape
    assert bool(jnp.all(jnp.isfinite(out)))
    ref = gfu_reference(apf, fab, params)
    max_err = float(jnp.max(jnp.abs(out - ref)))
    assert max_err < 2e-2, f"f32 path: max abs err vs reference {max_err}"

    # --- non-128-divisible HW path (wrapper pads HW, slices the output) ---
    H2 = W2 = 15
    apf2 = jax.random.normal(k_apf, (B, APF_C, H2, W2), jnp.float32)
    out2 = jax.jit(gfu_forward)(apf2, fab, params)
    jax.block_until_ready(out2)
    assert out2.shape == (B, OUT_C, H2, W2), out2.shape
    ref2 = gfu_reference(apf2, fab, params)
    err2 = float(jnp.max(jnp.abs(out2 - ref2)))
    assert err2 < 2e-2, f"padded path: max abs err vs reference {err2}"

    # --- bandwidth-optimized path: bf16 matmuls + bf16 output (loose tol) ---
    out_bf = jax.jit(lambda a, f, p: gfu_forward(
        a, f, p, matmul_dtype=jnp.bfloat16, out_dtype=jnp.bfloat16))(apf, fab, params)
    jax.block_until_ready(out_bf)
    assert out_bf.dtype == jnp.bfloat16
    err_bf = float(jnp.max(jnp.abs(out_bf.astype(jnp.float32) - ref)))
    assert err_bf < 1e-1, f"bf16 path: max abs err vs reference {err_bf}"

    print("KERNEL_OK")
</pallas_src>

<mosaic_0001>
module attributes {stable_mosaic.version = 11 : i64} {
  func.func @_gfu_kernel(%arg0: i32, %arg1: i32, %arg2: memref<1x8x256xf32, #tpu.memory_space<vmem>>, %arg3: memref<8x8xf32, #tpu.memory_space<vmem>>, %arg4: memref<8x1xf32, #tpu.memory_space<vmem>>, %arg5: memref<8x8xf32, #tpu.memory_space<vmem>>, %arg6: memref<1x8x1xf32, #tpu.memory_space<vmem>>, %arg7: memref<1x8x256xf32, #tpu.memory_space<vmem>>) attributes {dimension_semantics = [#tpu.dimension_semantics<parallel>, #tpu.dimension_semantics<parallel>], iteration_bounds = array<i64: 2, 1>, scalar_prefetch = 0 : i64, scratch_operands = 0 : i64, tpu.core_type = #tpu.core_type<tc>, window_params = [{transform_indices = @transform_0, window_bounds = array<i64: 1, 8, 256>}, {pipeline_mode = #tpu.pipeline_mode<synchronous>, transform_indices = @transform_1, window_bounds = array<i64: 8, 8>}, {pipeline_mode = #tpu.pipeline_mode<synchronous>, transform_indices = @transform_2, window_bounds = array<i64: 8, 1>}, {pipeline_mode = #tpu.pipeline_mode<synchronous>, transform_indices = @transform_3, window_bounds = array<i64: 8, 8>}, {transform_indices = @transform_4, window_bounds = array<i64: 1, 8, 1>}, {transform_indices = @transform_5, window_bounds = array<i64: 1, 8, 256>}]} {
    %c0 = arith.constant 0 : index
    %c0_0 = arith.constant 0 : index
    %c0_1 = arith.constant 0 : index
    %0 = vector.load %arg2[%c0, %c0_0, %c0_1] : memref<1x8x256xf32, #tpu.memory_space<vmem>>, vector<1x8x256xf32>
    %1 = vector.shape_cast %0 : vector<1x8x256xf32> to vector<8x256xf32>
    %c0_2 = arith.constant 0 : index
    %c0_3 = arith.constant 0 : index
    %2 = vector.load %arg3[%c0_2, %c0_3] : memref<8x8xf32, #tpu.memory_space<vmem>>, vector<8x8xf32>
    %cst = arith.constant dense<0.000000e+00> : vector<8x256xf32>
    %3 = tpu.matmul %2, %1, %cst {dimension_numbers = #tpu.dot_dimension_numbers<[1], [0], [0], [1], [0, 0, 1, 1], [], []>} : vector<8x8xf32>, vector<8x256xf32>, vector<8x256xf32> -> vector<8x256xf32>
    %c0_4 = arith.constant 0 : index
    %c0_5 = arith.constant 0 : index
    %4 = vector.load %arg4[%c0_4, %c0_5] : memref<8x1xf32, #tpu.memory_space<vmem>>, vector<8x1xf32>
    %5 = vector.broadcast %4 : vector<8x1xf32> to vector<8x256xf32>
    %6 = arith.addf %3, %5 : vector<8x256xf32>
    %cst_6 = arith.constant 0.000000e+00 : f32
    %7 = vector.broadcast %cst_6 : f32 to vector<8x256xf32>
    %8 = arith.maximumf %6, %7 : vector<8x256xf32>
    %c0_7 = arith.constant 0 : index
    %c0_8 = arith.constant 0 : index
    %9 = vector.load %arg5[%c0_7, %c0_8] : memref<8x8xf32, #tpu.memory_space<vmem>>, vector<8x8xf32>
    %cst_9 = arith.constant dense<0.000000e+00> : vector<8x256xf32>
    %10 = tpu.matmul %9, %8, %cst_9 {dimension_numbers = #tpu.dot_dimension_numbers<[1], [0], [0], [1], [0, 0, 1, 1], [], []>} : vector<8x8xf32>, vector<8x256xf32>, vector<8x256xf32> -> vector<8x256xf32>
    %c0_10 = arith.constant 0 : index
    %c0_11 = arith.constant 0 : index
    %c0_12 = arith.constant 0 : index
    %11 = vector.load %arg6[%c0_10, %c0_11, %c0_12] : memref<1x8x1xf32, #tpu.memory_space<vmem>>, vector<1x8x1xf32>
    %12 = vector.shape_cast %11 : vector<1x8x1xf32> to vector<8x1xf32>
    %13 = vector.broadcast %12 : vector<8x1xf32> to vector<8x256xf32>
    %14 = arith.addf %10, %13 : vector<8x256xf32>
    %cst_13 = arith.constant 0.000000e+00 : f32
    %15 = vector.broadcast %cst_13 : f32 to vector<8x256xf32>
    %16 = arith.maximumf %14, %15 : vector<8x256xf32>
    %c0_14 = arith.constant 0 : index
    %c0_15 = arith.constant 0 : index
    %c0_16 = arith.constant 0 : index
    %17 = vector.load %arg7[%c0_14, %c0_15, %c0_16] : memref<1x8x256xf32, #tpu.memory_space<vmem>>, vector<1x8x256xf32>
    %18 = vector.shape_cast %17 : vector<1x8x256xf32> to vector<8x256xf32>
    %19 = vector.shape_cast %16 : vector<8x256xf32> to vector<1x8x256xf32>
    tpu.vector_store %arg7[%c0_14, %c0_15, %c0_16], %19 {strides = array<i32>} : memref<1x8x256xf32, #tpu.memory_space<vmem>>, vector<1x8x256xf32>,
    return
  }
  func.func @transform_0(%arg0: i32, %arg1: i32) -> (i32, i32, i32) {
    %c0_i32 = arith.constant 0 : i32
    %c0_i32_0 = arith.constant 0 : i32
    return %arg0, %c0_i32, %arg1 : i32, i32, i32
  }
  func.func @transform_1(%arg0: i32, %arg1: i32) -> (i32, i32) {
    %c0_i32 = arith.constant 0 : i32
    %c0_i32_0 = arith.constant 0 : i32
    %c0_i32_1 = arith.constant 0 : i32
    return %c0_i32, %c0_i32_0 : i32, i32
  }
  func.func @transform_2(%arg0: i32, %arg1: i32) -> (i32, i32) {
    %c0_i32 = arith.constant 0 : i32
    %c0_i32_0 = arith.constant 0 : i32
    %c0_i32_1 = arith.constant 0 : i32
    return %c0_i32, %c0_i32_0 : i32, i32
  }
  func.func @transform_3(%arg0: i32, %arg1: i32) -> (i32, i32) {
    %c0_i32 = arith.constant 0 : i32
    %c0_i32_0 = arith.constant 0 : i32
    %c0_i32_1 = arith.constant 0 : i32
    return %c0_i32, %c0_i32_0 : i32, i32
  }
  func.func @transform_4(%arg0: i32, %arg1: i32) -> (i32, i32, i32) {
    %c0_i32 = arith.constant 0 : i32
    %c0_i32_0 = arith.constant 0 : i32
    %c0_i32_1 = arith.constant 0 : i32
    return %arg0, %c0_i32, %c0_i32_0 : i32, i32, i32
  }
  func.func @transform_5(%arg0: i32, %arg1: i32) -> (i32, i32, i32) {
    %c0_i32 = arith.constant 0 : i32
    %c0_i32_0 = arith.constant 0 : i32
    return %arg0, %c0_i32, %arg1 : i32, i32, i32
  }
}

</mosaic_0001>

<bundles_post_ra>
// kernel: gfu_forward.1
= control target key start
LH: loop header
LB: loop body
LE: loop exit
PB: predicated region body
PF: predicated region fallthrough
CT: control target
= control target key end

     0   :  { %s650_s18 = smov 0   ;;  %s652_s19 = smov 0   ;;  %s701_s0 = inlined_call_operand.vmem [shape: f32[2,8,256], index: 0, kind: input, shape index: {}]   ;;  %s702_s1 = inlined_call_operand.vmem [shape: f32[8,8], index: 1, kind: input, shape index: {}]   ;;  %s703_s2 = inlined_call_operand.vmem [shape: f32[8,1], index: 2, kind: input, shape index: {}]   ;;  %s704_s3 = inlined_call_operand.vmem [shape: f32[8,8], index: 3, kind: input, shape index: {}]   ;;  %s705_s4 = inlined_call_operand.vmem [shape: f32[2,8,1], index: 4, kind: input, shape index: {}]   ;;  %s706_s5 = inlined_call_operand.vmem [shape: f32[2,8,256], index: 5, kind: output, shape index: {}]  }
   0x1   :  { %s654_s20 = smov 0  }
   0x2 LB: > { %s27_s21 = sadd.s32 1, %s612_s19  ;;  %p555_p0 = scmp.ge.s32.totalorder %s616_s20, 1  ;;  %s616_s20 = sphi %s654_s20, %s15_s20   ;;  %s612_s19 = sphi %s652_s19, %s708_s19   ;;  %s608_s18 = sphi %s650_s18, %s707_s18  }
   0x3   : > { %p29_p1 = scmp.ge.s32.totalorder %s27_s21, 2  ;;  %p217_p2 = scmp.lt.s32.totalorder %s616_s20, 3 }
   0x5   : > { %s710_s21 = smov (%p29_p1, %s27_s21), 0  ;;  %p218_p3 = pnand %p555_p0, %p217_p2 }
   0x6   : > { %p258_p4 = scmp.lt.s32.totalorder (!%p218_p3), %s608_s18, 1  ;;  %v284_v0 = vld [vmem:[%s703_s2] sm:$0xff] (!%p218_p3)  ;;  %v618_v1 = vmov (!%p218_p3), 0.0   ;;  %v619_v2 = vmov (!%p218_p3), 0   ;;  %vm290_vm0 = vcmask (!%p218_p3), 64512  }
   0x7   : > { %221 = sbr.rel (%p218_p3) target bundleno = 457 (0x1c9), region = 40  ;;  %358 = vmatprep.mubr.f32.mxu0 (!%p218_p3), %v618_v1  ;;  %593 = vset.pattern.permute.xlu0 (!%p218_p3), %v619_v2  ;;  %v283_v5 = vld [vmem:[%s702_s1] sm:$0xff] (!%p218_p3) }
   0x8   : > { %287 = vperm.xlu0 (!%p218_p3), %593, %v284_v0   ;;  %441 = vmatprep.mubr.f32.mxu1 (!%p218_p3), %v618_v1  ;;  %v367_v14 = vld [vmem:[%s704_s3] sm:$0xff] (!%p218_p3) }
   0xe   : > { %s712_s18 = smov (!%p258_p4, %s608_s18), 1 }
   0xf   : > { %s565_s24 = sshll.u32 %s712_s18, 4  ;;  %s558_s25 = sshll.u32 %s712_s18, 3 }
  0x10   : > { %s265_s28 = scalar_lea.vmem %s701_s0, %s565_s24  ;;  %s270_s8 = scalar_lea.vmem %s705_s4, %s558_s25 }
  0x11   : > { %v282_v3 = vld [vmem:[%s265_s28 + $0x8] sm:$0xff]  ;;  %v281_v4 = vld [vmem:[%s265_s28] sm:$0xff]  ;;  %s279_s13 = scalar_lea.vmem %s706_s5, %s565_s24 }
  0x12   : > { %294 = vmatprep.subr.mxu0 %v282_v3  ;;  %v368_v6 = vld [vmem:[%s270_s8] sm:$0xff] }
  0x13   : > { %295 = vmatpush1.msra.mxu0 %v281_v4  ;;  %371 = vperm.xlu0 %593, %v368_v6  }
  0x14   : > { %561 = vmatmul.mubr.msk.f32.vlgmr.msra.gmra.mrb[0].mxu0 %vm290_vm0, %v283_v5 }
  0x87   : > { %v288_v7 = vpop.permute.xlu0 %287 }
  0x92   : > { %v372_v15 = vpop.permute.xlu0 %371 }
  0xe7   : > { %v360_v8 = vpop.f32.mrb[0].mxu0 }
  0xe8   : > { %v361_v9 = vadd.f32 %v360_v8, %v288_v7  ;;  %v362_v10 = vpop.f32.mrb[1].mxu0 }
  0xe9   : > { %v363_v11 = vadd.f32 %v362_v10, %v288_v7 }
  0xea   : > { %v365_v13 = vmax.f32 %v361_v9, 0.0 }
  0xeb   : > { %v366_v12 = vmax.f32 %v363_v11, 0.0 }
  0xed   : > { %377 = vmatprep.subr.mxu1 %v366_v12 }
  0xee   : > { %378 = vmatpush1.msra.mxu1 %v365_v13 }
  0xef   : > { %562 = vmatmul.mubr.msk.f32.vlgmr.msra.gmra.mrb[0].mxu1 %vm290_vm0, %v367_v14 }
 0x1c2   : > { %v443_v16 = vpop.f32.mrb[0].mxu1 }
 0x1c3   : > { %v444_v17 = vadd.f32 %v443_v16, %v372_v15  ;;  %v445_v18 = vpop.f32.mrb[1].mxu1 }
 0x1c4   : > { %v446_v19 = vadd.f32 %v445_v18, %v372_v15 }
 0x1c5   : > { %v448_v20 = vmax.f32 %v444_v17, 0.0 }
 0x1c6   : > { %v449_v21 = vmax.f32 %v446_v19, 0.0 }
 0x1c7   : > { %450 = vst [vmem:[%s279_s13] sm:$0xff] %v448_v20 }
 0x1c8   : > { %451 = vst [vmem:[%s279_s13 + $0x8] sm:$0xff] %v449_v21 }
 0x1c9 PF: > { %s15_s20 = sadd.s32 1, %s616_s20   ;;  %s707_s18 = smov %s612_s19 }
 0x1ca   : > { %p12_p5 = scmp.ge.s32.totalorder %s15_s20, 4   ;;  %s708_s19 = smov %s710_s21 }
 0x1cc   :  { %14 = sbr.rel (!%p12_p5) target bundleno = 2 (0x2), region = 73 }

</bundles_post_ra>
